<compile_context>
chip_gen: v7x
topology: tpu7x:2x2x1
jax: 0.10.0
libtpu: 0.0.40
codegen_flags: <defaults>
</compile_context>

<pallas_src>
import functools

import jax
import jax.numpy as jnp
from jax.experimental import pallas as pl
from jax.experimental.pallas import tpu as pltpu


def _round_up(x, m):
    return ((x + m - 1) // m) * m


def _ceil_div(a, b):
    return -(-a // b)


def _tpu_vmem_and_cores():
    """Best-effort hardware query: (per-core VMEM bytes, TensorCores per chip)."""
    vmem = 64 * 1024 * 1024  # conservative (v7x-sized) default
    cores = 1
    try:
        info = pltpu.get_tpu_info()
        vmem = int(getattr(info, "vmem_capacity_bytes", vmem))
        cores = int(getattr(info, "num_cores", 0) or 0)
        if cores <= 0:
            # v7x has 64 MiB VMEM per TC and 2 TCs; v5e/v6e have 128 MiB and 1 TC.
            cores = 2 if vmem <= 64 * 1024 * 1024 else 1
    except Exception:
        pass
    return vmem, cores


def _resident_spec(shape):
    """BlockSpec for a grid-invariant (resident) operand: single-buffered, constant index."""
    try:
        return pl.BlockSpec(shape, lambda i: (0, 0), pipeline_mode=pl.Buffered(1))
    except TypeError:  # older pallas without pipeline_mode kwarg
        return pl.BlockSpec(shape, lambda i: (0, 0))


def _adapter_compute(x, wd, bd, wu, bu, res, out_ref, *, scale, add_residual):
    # down projection + bias + ReLU (dropout p=0.0 is a no-op); MXU matmul in the input
    # dtype with f32 accumulation.
    down = jnp.dot(x, wd, preferred_element_type=jnp.float32)
    down = jnp.maximum(down + bd.astype(jnp.float32), 0.0)
    # up projection + bias + scale (+ residual)
    up = jnp.dot(down.astype(x.dtype), wu, preferred_element_type=jnp.float32)
    up = (up + bu.astype(jnp.float32)) * scale
    if add_residual:
        up = up + res.astype(jnp.float32)
    out_ref[...] = up.astype(out_ref.dtype)


def _kernel_shared_residual(x_ref, wd_ref, bd_ref, wu_ref, bu_ref, out_ref,
                            *, scale, add_residual):
    # Residual == x: reuse the already-loaded x tile, no second HBM stream.
    x = x_ref[...]
    _adapter_compute(x, wd_ref[...], bd_ref[...], wu_ref[...], bu_ref[...], x, out_ref,
                     scale=scale, add_residual=add_residual)


def _kernel_separate_residual(x_ref, res_ref, wd_ref, bd_ref, wu_ref, bu_ref, out_ref,
                              *, scale, add_residual):
    _adapter_compute(x_ref[...], wd_ref[...], bd_ref[...], wu_ref[...], bu_ref[...],
                     res_ref[...], out_ref, scale=scale, add_residual=add_residual)


def adapter_forward(x, params, *, scale=1.0, add_residual=True, residual=None, tn=None):
    """Fused Adapter forward.  x: (B, S, d_model)."""
    wd, bd, wu, bu = params
    B, S, D = x.shape
    bneck = wd.shape[1]
    N = B * S
    dtype = x.dtype
    itemsize = jnp.dtype(dtype).itemsize

    # Pad bottleneck / d_model to multiples of 128 (lane-dense vregs, unmasked stores).
    bp = _round_up(bneck, 128)
    Dp = _round_up(D, 128)
    if bp != bneck:
        wd = jnp.pad(wd, ((0, 0), (0, bp - bneck)))
        bd = jnp.pad(bd, ((0, bp - bneck),))
        wu = jnp.pad(wu, ((0, bp - bneck), (0, 0)))
    if Dp != D:
        wd = jnp.pad(wd, ((0, Dp - D), (0, 0)))
        wu = jnp.pad(wu, ((0, 0), (0, Dp - D)))
        bu = jnp.pad(bu, ((0, Dp - D),))

    # Run the MXU in the activation dtype (f32 accumulate kept in-kernel): halves weight
    # HBM/VMEM bytes when x is bf16.
    wd = wd.astype(dtype)
    wu = wu.astype(dtype)
    bd = bd.astype(dtype)
    bu = bu.astype(dtype)

    separate_residual = bool(add_residual) and (residual is not None)
    n_act_streams = 2 + (1 if separate_residual else 0)  # x, out, [res]

    # ---- generation-aware VMEM budgeting ------------------------------------------------
    vmem_cap, num_cores = _tpu_vmem_and_cores()
    if vmem_cap <= 64 * 1024 * 1024:      # v7x-like: leave headroom below 64 MiB physical
        cap = 52 * 1024 * 1024
        act_target = 12 * 1024 * 1024
    else:                                 # v5e / v6e: 128 MiB physical
        cap = 100 * 1024 * 1024
        act_target = 40 * 1024 * 1024
    headroom = 4 * 1024 * 1024

    w_itemsize = jnp.dtype(wd.dtype).itemsize
    # Single-buffered residents: W_down + W_up + both biases.
    weight_bytes = 2 * Dp * bp * w_itemsize + (bp + Dp) * w_itemsize

    # Per-token-row VMEM bytes: double-buffered activation tiles + in-kernel f32
    # intermediates (down f32, its x.dtype cast, up f32).
    per_row = (2 * n_act_streams * Dp * itemsize
               + bp * 4 + bp * itemsize + Dp * 4)

    act_budget = max(2 * 1024 * 1024, min(act_target, cap - weight_bytes - headroom))

    # Sublane packing granule: 8 rows for 4-byte, 16 for 2-byte, 32 for 1-byte dtypes.
    sub = max(8, 32 // itemsize)

    if tn is None:
        rows = max(sub, act_budget // per_row)
        if rows >= 256:
            tn = (rows // 256) * 256
        elif rows >= 128:
            tn = 128
        else:
            tn = (rows // sub) * sub
    tn = int(max(sub, min(int(tn), 2048)))

    # v7x (2 TCs): make the parallel-grid step count EVEN so both cores get equal work.
    # Single-core chips: no forced split (it only adds per-step overhead).
    if num_cores >= 2 and N > sub:
        steps = 2 * max(1, _ceil_div(N, 2 * tn))
        tn = _round_up(_ceil_div(N, steps), sub)
    tn = int(max(sub, min(tn, _round_up(N, sub))))

    Np = _round_up(N, tn)

    x2 = x.reshape(N, D)
    if Np != N or Dp != D:
        x2 = jnp.pad(x2, ((0, Np - N), (0, Dp - D)))

    args = [x2]
    in_specs = [pl.BlockSpec((tn, Dp), lambda i: (i, 0))]

    if separate_residual:
        r2 = residual.reshape(N, D)
        if Np != N or Dp != D:
            r2 = jnp.pad(r2, ((0, Np - N), (0, Dp - D)))
        args.append(r2)
        in_specs.append(pl.BlockSpec((tn, Dp), lambda i: (i, 0)))
        kernel = functools.partial(_kernel_separate_residual,
                                   scale=float(scale), add_residual=True)
    else:
        kernel = functools.partial(_kernel_shared_residual,
                                   scale=float(scale), add_residual=bool(add_residual))

    bd2 = bd.reshape(1, bp)
    bu2 = bu.reshape(1, Dp)
    args += [wd, bd2, wu, bu2]
    in_specs += [
        _resident_spec((Dp, bp)),   # W_down (resident, single-buffered)
        _resident_spec((1, bp)),    # b_down
        _resident_spec((bp, Dp)),   # W_up
        _resident_spec((1, Dp)),    # b_up
    ]

    act_tile_bytes = 2 * n_act_streams * tn * Dp * itemsize
    inter_bytes = tn * (bp * 4 + bp * itemsize + Dp * 4)
    vmem_needed = act_tile_bytes + inter_bytes + weight_bytes + headroom
    vmem_limit = int(min(cap, max(32 * 1024 * 1024, vmem_needed)))

    cost = pl.CostEstimate(
        flops=int(4 * Np * Dp * bp),   # two matmuls, 2*N*D*bp each
        transcendentals=0,
        bytes_accessed=int(n_act_streams * N * D * itemsize + weight_bytes),
    )

    out = pl.pallas_call(
        kernel,
        out_shape=jax.ShapeDtypeStruct((Np, Dp), dtype),
        grid_spec=pltpu.PrefetchScalarGridSpec(
            num_scalar_prefetch=0,
            grid=(Np // tn,),
            in_specs=in_specs,
            out_specs=pl.BlockSpec((tn, Dp), lambda i: (i, 0)),
        ),
        compiler_params=pltpu.CompilerParams(
            dimension_semantics=("parallel",),
            vmem_limit_bytes=vmem_limit,
        ),
        cost_estimate=cost,
    )(*args)

    if Np != N or Dp != D:
        out = out[:N, :D]
    return out.reshape(B, S, D)


def init_adapter_params(key, d_model, bottleneck):
    """Deterministic synthetic parameter init (weights stored as (in, out))."""
    k1, k2, k3, k4 = jax.random.split(key, 4)
    wd = jax.random.normal(k1, (d_model, bottleneck), jnp.float32) * 0.02
    bd = jax.random.normal(k2, (bottleneck,), jnp.float32) * 0.02
    wu = jax.random.normal(k3, (bottleneck, d_model), jnp.float32) * 0.02
    bu = jax.random.normal(k4, (d_model,), jnp.float32) * 0.02
    return wd, bd, wu, bu


def adapter_reference(x, params, *, scale=1.0, add_residual=True, residual=None):
    wd, bd, wu, bu = params
    down = jnp.maximum(x @ wd + bd, 0.0)
    up = (down @ wu + bu) * scale
    if not add_residual:
        return up
    res = x if residual is None else residual
    return up + res


if __name__ == "__main__":
    d_model = 128
    bottleneck = 64
    B, S = 2, 8

    key = jax.random.PRNGKey(0)
    kx, kp, kr = jax.random.split(key, 3)
    x = jax.random.normal(kx, (B, S, d_model), jnp.float32)
    params = init_adapter_params(kp, d_model, bottleneck)

    # 1) default path: residual shared with x (single input stream)
    out = jax.block_until_ready(adapter_forward(x, params, scale=1.0, add_residual=True))
    ref = adapter_reference(x, params, scale=1.0, add_residual=True)
    assert out.shape == (B, S, d_model)
    assert jnp.allclose(out, ref, atol=1e-5, rtol=1e-5), "mismatch (shared residual)"

    # 2) no-residual path (compile-time flag, no zeros stream)
    out2 = jax.block_until_ready(adapter_forward(x, params, scale=1.0, add_residual=False))
    ref2 = adapter_reference(x, params, scale=1.0, add_residual=False)
    assert jnp.allclose(out2, ref2, atol=1e-5, rtol=1e-5), "mismatch (no residual)"

    # 3) explicit residual path
    res = jax.random.normal(kr, (B, S, d_model), jnp.float32)
    out3 = jax.block_until_ready(
        adapter_forward(x, params, scale=1.0, add_residual=True, residual=res))
    ref3 = adapter_reference(x, params, scale=1.0, add_residual=True, residual=res)
    assert jnp.allclose(out3, ref3, atol=1e-5, rtol=1e-5), "mismatch (separate residual)"

    # 4) token count not divisible by the tile size (exercises wrapper padding)
    x_odd = jax.random.normal(kx, (1, 5, d_model), jnp.float32)
    out4 = jax.block_until_ready(adapter_forward(x_odd, params, scale=1.0, add_residual=True))
    ref4 = adapter_reference(x_odd, params, scale=1.0, add_residual=True)
    assert out4.shape == (1, 5, d_model)
    assert jnp.allclose(out4, ref4, atol=1e-5, rtol=1e-5), "mismatch (padded tokens)"

    print("KERNEL_OK")
</pallas_src>

<mosaic_0001>
module attributes {stable_mosaic.version = 11 : i64} {
  func.func @_kernel_shared_residual(%arg0: i32, %arg1: memref<16x128xf32, #tpu.memory_space<vmem>>, %arg2: memref<128x128xf32, #tpu.memory_space<vmem>>, %arg3: memref<1x128xf32, #tpu.memory_space<vmem>>, %arg4: memref<128x128xf32, #tpu.memory_space<vmem>>, %arg5: memref<1x128xf32, #tpu.memory_space<vmem>>, %arg6: memref<16x128xf32, #tpu.memory_space<vmem>>) attributes {dimension_semantics = [#tpu.dimension_semantics<parallel>], iteration_bounds = array<i64: 1>, scalar_prefetch = 0 : i64, scratch_operands = 0 : i64, tpu.core_type = #tpu.core_type<tc>, window_params = [{transform_indices = @transform_0, window_bounds = array<i64: 16, 128>}, {pipeline_mode = #tpu.pipeline_mode<synchronous>, transform_indices = @transform_1, window_bounds = array<i64: 128, 128>}, {pipeline_mode = #tpu.pipeline_mode<synchronous>, transform_indices = @transform_2, window_bounds = array<i64: 1, 128>}, {pipeline_mode = #tpu.pipeline_mode<synchronous>, transform_indices = @transform_3, window_bounds = array<i64: 128, 128>}, {pipeline_mode = #tpu.pipeline_mode<synchronous>, transform_indices = @transform_4, window_bounds = array<i64: 1, 128>}, {transform_indices = @transform_5, window_bounds = array<i64: 16, 128>}]} {
    %c0 = arith.constant 0 : index
    %c0_0 = arith.constant 0 : index
    %0 = vector.load %arg1[%c0, %c0_0] : memref<16x128xf32, #tpu.memory_space<vmem>>, vector<16x128xf32>
    %c0_1 = arith.constant 0 : index
    %c0_2 = arith.constant 0 : index
    %1 = vector.load %arg2[%c0_1, %c0_2] : memref<128x128xf32, #tpu.memory_space<vmem>>, vector<128x128xf32>
    %c0_3 = arith.constant 0 : index
    %c0_4 = arith.constant 0 : index
    %2 = vector.load %arg3[%c0_3, %c0_4] : memref<1x128xf32, #tpu.memory_space<vmem>>, vector<1x128xf32>
    %c0_5 = arith.constant 0 : index
    %c0_6 = arith.constant 0 : index
    %3 = vector.load %arg4[%c0_5, %c0_6] : memref<128x128xf32, #tpu.memory_space<vmem>>, vector<128x128xf32>
    %c0_7 = arith.constant 0 : index
    %c0_8 = arith.constant 0 : index
    %4 = vector.load %arg5[%c0_7, %c0_8] : memref<1x128xf32, #tpu.memory_space<vmem>>, vector<1x128xf32>
    %cst = arith.constant dense<0.000000e+00> : vector<16x128xf32>
    %5 = tpu.matmul %0, %1, %cst {dimension_numbers = #tpu.dot_dimension_numbers<[1], [0], [0], [1], [0, 0, 1, 1], [], []>} : vector<16x128xf32>, vector<128x128xf32>, vector<16x128xf32> -> vector<16x128xf32>
    %6 = vector.broadcast %2 : vector<1x128xf32> to vector<16x128xf32>
    %7 = arith.addf %5, %6 : vector<16x128xf32>
    %cst_9 = arith.constant 0.000000e+00 : f32
    %8 = vector.broadcast %cst_9 : f32 to vector<16x128xf32>
    %9 = arith.maximumf %7, %8 : vector<16x128xf32>
    %cst_10 = arith.constant dense<0.000000e+00> : vector<16x128xf32>
    %10 = tpu.matmul %9, %3, %cst_10 {dimension_numbers = #tpu.dot_dimension_numbers<[1], [0], [0], [1], [0, 0, 1, 1], [], []>} : vector<16x128xf32>, vector<128x128xf32>, vector<16x128xf32> -> vector<16x128xf32>
    %11 = vector.broadcast %4 : vector<1x128xf32> to vector<16x128xf32>
    %12 = arith.addf %10, %11 : vector<16x128xf32>
    %cst_11 = arith.constant 1.000000e+00 : f32
    %13 = vector.broadcast %cst_11 : f32 to vector<16x128xf32>
    %14 = arith.mulf %12, %13 : vector<16x128xf32>
    %15 = arith.addf %14, %0 : vector<16x128xf32>
    %c0_12 = arith.constant 0 : index
    %c0_13 = arith.constant 0 : index
    %16 = vector.load %arg6[%c0_12, %c0_13] : memref<16x128xf32, #tpu.memory_space<vmem>>, vector<16x128xf32>
    tpu.vector_store %arg6[%c0_12, %c0_13], %15 {strides = array<i32>} : memref<16x128xf32, #tpu.memory_space<vmem>>, vector<16x128xf32>,
    return
  }
  func.func @transform_0(%arg0: i32) -> (i32, i32) {
    %c0_i32 = arith.constant 0 : i32
    %c0_i32_0 = arith.constant 0 : i32
    return %arg0, %c0_i32 : i32, i32
  }
  func.func @transform_1(%arg0: i32) -> (i32, i32) {
    %c0_i32 = arith.constant 0 : i32
    %c0_i32_0 = arith.constant 0 : i32
    %c0_i32_1 = arith.constant 0 : i32
    return %c0_i32, %c0_i32_0 : i32, i32
  }
  func.func @transform_2(%arg0: i32) -> (i32, i32) {
    %c0_i32 = arith.constant 0 : i32
    %c0_i32_0 = arith.constant 0 : i32
    %c0_i32_1 = arith.constant 0 : i32
    return %c0_i32, %c0_i32_0 : i32, i32
  }
  func.func @transform_3(%arg0: i32) -> (i32, i32) {
    %c0_i32 = arith.constant 0 : i32
    %c0_i32_0 = arith.constant 0 : i32
    %c0_i32_1 = arith.constant 0 : i32
    return %c0_i32, %c0_i32_0 : i32, i32
  }
  func.func @transform_4(%arg0: i32) -> (i32, i32) {
    %c0_i32 = arith.constant 0 : i32
    %c0_i32_0 = arith.constant 0 : i32
    %c0_i32_1 = arith.constant 0 : i32
    return %c0_i32, %c0_i32_0 : i32, i32
  }
  func.func @transform_5(%arg0: i32) -> (i32, i32) {
    %c0_i32 = arith.constant 0 : i32
    %c0_i32_0 = arith.constant 0 : i32
    return %arg0, %c0_i32 : i32, i32
  }
}

</mosaic_0001>

<bundles_post_ra>
// kernel: tpu_custom_call.1
= control target key start
LH: loop header
LB: loop body
LE: loop exit
PB: predicated region body
PF: predicated region fallthrough
CT: control target
= control target key end

     0   :  { %10 = vsyncpa [#allocation3], 0  ;;  %s669_s0 = inlined_call_operand.hbm [shape: f32[16,128], index: 0, kind: input, shape index: {}]   ;;  %s670_s1 = inlined_call_operand.hbm [shape: f32[128,128], index: 1, kind: input, shape index: {}]   ;;  %s671_s2 = inlined_call_operand.vmem [shape: f32[1,128], index: 2, kind: input, shape index: {}]   ;;  %s672_s3 = inlined_call_operand.hbm [shape: f32[128,128], index: 3, kind: input, shape index: {}]   ;;  %s673_s4 = inlined_call_operand.vmem [shape: f32[1,128], index: 4, kind: input, shape index: {}]   ;;  %s674_s5 = inlined_call_operand.hbm [shape: f32[16,128], index: 5, kind: output, shape index: {}]  }
   0x1   :  { %11 = vsyncpa [#allocation6], 0 }
   0x2   :  { %12 = vsyncpa [#allocation4], 0  ;;  %s556_s18 = smov [#allocation5]   ;;  %s557_s20 = smov [#allocation2]  }
   0x3   :  { %s30_s19 = sshll.u32 %s556_s18, 4  ;;  %s18_s21 = sshll.u32 %s557_s20, 4  ;;  %s31_s19 = int_to_ptr.vmem [resolvable:$true] %s30_s19  ;;  %s592_s21 = int_to_ptr.vmem [resolvable:$true] %s18_s21 }
   0x4   :  { %s462_s24 = scalar_lea.hbm %s670_s1, 2048 }
   0x5   :  { %p463_p0 = scmp.ne.s32.totalorder %s670_s1, %s462_s24  ;;  %p466_p1 = scmp.lt.u32.totalorder %s462_s24, %s670_s1 }
   0x7   :  { %p468_p2 = pnand %p466_p1, %p463_p0 }
   0x9   :  { %471 = shalt.err (!%p468_p2)
}
   0xa   :  { %s472_s29 = scalar_lea.vmem %s31_s19, 2048  ;;  %p477_p4 = scmp.lt.s32.totalorder %s31_s19, %s31_s19 }
   0xb   :  { %p473_p3 = scmp.ne.s32.totalorder %s31_s19, %s472_s29  ;;  %p478_p5 = scmp.lt.s32.totalorder %s472_s29, %s472_s29 }
   0xd   :  { %p479_p6 = por %p478_p5, %p477_p4 }
   0xf   :  { %p480_p7 = pnand %p479_p6, %p473_p3 }
  0x11   :  { %483 = shalt.err (!%p480_p7)
}
  0x12   :  { %s558_s30 = smov 128   ;;  %s559_s6 = smov 8  }
  0x13   :  { %36 = dma.hbm_to_vmem [thread:$0]  %s670_s1, 2048, %s31_s19, [#allocation6], %s558_s30, %s558_s30, %s559_s6  }
  0x14   :  { %s484_s11 = scalar_lea.hbm %s669_s0, 256 }
  0x15   :  { %p485_p8 = scmp.ne.s32.totalorder %s669_s0, %s484_s11  ;;  %p488_p9 = scmp.lt.u32.totalorder %s484_s11, %s669_s0 }
  0x17   :  { %p490_p10 = pnand %p488_p9, %p485_p8 }
  0x19   :  { %493 = shalt.err (!%p490_p10)
}
  0x1a   :  { %s494_s16 = scalar_lea.vmem %s592_s21, 256  ;;  %p499_p12 = scmp.lt.s32.totalorder %s592_s21, %s592_s21 }
  0x1b   :  { %p495_p11 = scmp.ne.s32.totalorder %s592_s21, %s494_s16  ;;  %p500_p13 = scmp.lt.s32.totalorder %s494_s16, %s494_s16 }
  0x1d   :  { %p501_p0 = por %p500_p13, %p499_p12 }
  0x1f   :  { %p502_p1 = pnand %p501_p0, %p495_p11 }
  0x21   :  { %505 = shalt.err (!%p502_p1)
}
  0x22   :  { %24 = dma.hbm_to_vmem [thread:$0]  %s669_s0, 256, %s592_s21, [#allocation3], %s558_s30, %s558_s30, %s559_s6  }
  0x23   :  { %s560_s18 = smov [#allocation7]   ;;  %s506_s23 = scalar_lea.hbm %s672_s3, 2048 }
  0x24   :  { %s44_s19 = sshll.u32 %s560_s18, 4  ;;  %p507_p2 = scmp.ne.s32.totalorder %s672_s3, %s506_s23  ;;  %s45_s19 = int_to_ptr.vmem [resolvable:$true] %s44_s19 }
  0x25   :  { %p510_p3 = scmp.lt.u32.totalorder %s506_s23, %s672_s3 }
  0x27   :  { %p512_p4 = pnand %p510_p3, %p507_p2 }
  0x29   :  { %515 = shalt.err (!%p512_p4)
}
  0x2a   :  { %s516_s28 = scalar_lea.vmem %s45_s19, 2048  ;;  %p521_p6 = scmp.lt.s32.totalorder %s45_s19, %s45_s19 }
  0x2b   :  { %p517_p5 = scmp.ne.s32.totalorder %s45_s19, %s516_s28  ;;  %p522_p7 = scmp.lt.s32.totalorder %s516_s28, %s516_s28 }
  0x2d   :  { %p523_p8 = por %p522_p7, %p521_p6 }
  0x2f   :  { %p524_p9 = pnand %p523_p8, %p517_p5 }
  0x31   :  { %527 = shalt.err (!%p524_p9)
}
  0x32   :  { %50 = dma.hbm_to_vmem [thread:$0]  %s672_s3, 2048, %s45_s19, [#allocation6], %s558_s30, %s558_s30, %s559_s6  }
  0x33   :  { %550 = dma.done.wait [#allocation3], 256  }
  0x34   :  { %551 = vsyncadd [#allocation3], 4294967040 }
  0x35   :  { %552 = dma.done.wait [#allocation6], 4096  }
  0x36   :  { %553 = vsyncadd [#allocation6], 4294963200  ;;  %v64_v0 = vld [vmem:[#allocation5] sm:$0xff]  ;;  %v65_v1 = vld [vmem:[#allocation5 + $0x8] sm:$0xff]  ;;  %s561_s9 = smov [#allocation8]  }
  0x37   :  { %v66_v2 = vld [vmem:[#allocation5 + $0x10] sm:$0xff]  ;;  %v392_v3 = vpack.c.bf16 %v65_v1, %v64_v0  ;;  %v67_v4 = vld [vmem:[#allocation5 + $0x18] sm:$0xff]  ;;  %v68_v6 = vld [vmem:[#allocation5 + $0x20] sm:$0xff]  ;;  %s271_s10 = sshll.u32 %s561_s9, 4  ;;  %s272_s10 = int_to_ptr.vmem [resolvable:$true] %s271_s10 }
  0x38   :  { %v396_v5 = vpack.c.bf16 %v67_v4, %v66_v2  ;;  %v69_v7 = vld [vmem:[#allocation5 + $0x28] sm:$0xff]  ;;  %v70_v9 = vld [vmem:[#allocation5 + $0x30] sm:$0xff]  ;;  %v71_v10 = vld [vmem:[#allocation5 + $0x38] sm:$0xff]  ;;  %p533_p11 = scmp.lt.s32.totalorder %s272_s10, %s272_s10 }
  0x39   :  { %393 = vmatprep.subr.bf16.mxu0 %v392_v3  ;;  %v400_v8 = vpack.c.bf16 %v69_v7, %v68_v6  ;;  %v644_v11 = vld [vmem:[#allocation2] sm:$0xff]  ;;  %v81_v12 = vld [vmem:[#allocation7] sm:$0xff]  ;;  %v82_v13 = vld [vmem:[#allocation7 + $0x8] sm:$0xff]  ;;  %v404_v20 = vpack.c.bf16 %v71_v10, %v70_v9 }
  0x3a   :  { %395 = vmatpush3.bf16.msra.mxu0 %v392_v3  ;;  %354 = vmatprep.mubr.f32.mxu0 %v644_v11  ;;  %v83_v14 = vld [vmem:[#allocation7 + $0x10] sm:$0xff]  ;;  %v424_v15 = vpack.c.bf16 %v82_v13, %v81_v12  ;;  %v84_v16 = vld [vmem:[#allocation7 + $0x18] sm:$0xff]  ;;  %v85_v18 = vld [vmem:[#allocation7 + $0x20] sm:$0xff] }
  0x3b   :  { %397 = vmatprep.subr.bf16.mxu0 %v396_v5  ;;  %v428_v17 = vpack.c.bf16 %v84_v16, %v83_v14  ;;  %v86_v19 = vld [vmem:[#allocation7 + $0x28] sm:$0xff]  ;;  %v72_v21 = vld [vmem:[#allocation5 + $0x40] sm:$0xff]  ;;  %v87_v24 = vld [vmem:[#allocation7 + $0x30] sm:$0xff] }
  0x3c   :  { %425 = vmatprep.subr.bf16.mxu1 %v424_v15  ;;  %v73_v22 = vld [vmem:[#allocation5 + $0x48] sm:$0xff]  ;;  %v432_v23 = vpack.c.bf16 %v86_v19, %v85_v18  ;;  %v88_v25 = vld [vmem:[#allocation7 + $0x38] sm:$0xff]  ;;  %v74_v27 = vld [vmem:[#allocation5 + $0x50] sm:$0xff] }
  0x3d   :  { %427 = vmatpush3.bf16.msra.mxu1 %v424_v15  ;;  %v408_v26 = vpack.c.bf16 %v73_v22, %v72_v21  ;;  %v75_v28 = vld [vmem:[#allocation5 + $0x58] sm:$0xff]  ;;  %v436_v29 = vpack.c.bf16 %v88_v25, %v87_v24  ;;  %v89_v30 = vld [vmem:[#allocation7 + $0x40] sm:$0xff]  ;;  %v90_v31 = vld [vmem:[#allocation7 + $0x48] sm:$0xff] }
  0x3e   :  { %399 = vmatpush3.bf16.msra.mxu0 %v396_v5  ;;  %429 = vmatprep.subr.bf16.mxu1 %v428_v17  ;;  %v412_v32 = vpack.c.bf16 %v75_v28, %v74_v27  ;;  %v76_v33 = vld [vmem:[#allocation5 + $0x60] sm:$0xff]  ;;  %v77_v34 = vld [vmem:[#allocation5 + $0x68] sm:$0xff]  ;;  %v440_v35 = vpack.c.bf16 %v90_v31, %v89_v30  ;;  %v91_v36 = vld [vmem:[#allocation7 + $0x50] sm:$0xff] }
  0x3f   :  { %401 = vmatprep.subr.bf16.mxu0 %v400_v8  ;;  %v92_v37 = vld [vmem:[#allocation7 + $0x58] sm:$0xff]  ;;  %v416_v38 = vpack.c.bf16 %v77_v34, %v76_v33  ;;  %v78_v39 = vld [vmem:[#allocation5 + $0x70] sm:$0xff]  ;;  %v93_v42 = vld [vmem:[#allocation7 + $0x60] sm:$0xff] }
  0x40   :  { %v79_v40 = vld [vmem:[#allocation5 + $0x78] sm:$0xff]  ;;  %v444_v41 = vpack.c.bf16 %v92_v37, %v91_v36  ;;  %v94_v43 = vld [vmem:[#allocation7 + $0x68] sm:$0xff]  ;;  %v95_v47 = vld [vmem:[#allocation7 + $0x70] sm:$0xff] }
  0x41   :  { %431 = vmatpush3.bf16.msra.mxu1 %v428_v17  ;;  %v420_v44 = vpack.c.bf16 %v79_v40, %v78_v39  ;;  %v448_v45 = vpack.c.bf16 %v94_v43, %v93_v42  ;;  %v63_v46 = vld [vmem:[#allocation2 + $0x8] sm:$0xff]  ;;  %v284_v50 = vld [vmem:[%s671_s2] ss:$0 sm:$0xff]  ;;  %s528_s2 = scalar_lea.vmem %s272_s10, 256 }
  0x42   :  { %403 = vmatpush3.bf16.msra.mxu0 %v400_v8  ;;  %433 = vmatprep.subr.bf16.mxu1 %v432_v23  ;;  %v96_v48 = vld [vmem:[#allocation7 + $0x78] sm:$0xff]  ;;  %v285_v57 = vld [vmem:[%s673_s4] ss:$0 sm:$0xff]  ;;  %p529_p10 = scmp.ne.s32.totalorder %s272_s10, %s528_s2  ;;  %p534_p12 = scmp.lt.s32.totalorder %s528_s2, %s528_s2 }
  0x43   :  { %405 = vmatprep.subr.bf16.mxu0 %v404_v20  ;;  %v452_v49 = vpack.c.bf16 %v96_v48, %v95_v47 }
  0x44   :  { %p535_p13 = por %p534_p12, %p533_p11 }
  0x45   :  { %435 = vmatpush3.bf16.msra.mxu1 %v432_v23 }
  0x46   :  { %407 = vmatpush3.bf16.msra.mxu0 %v404_v20  ;;  %437 = vmatprep.subr.bf16.mxu1 %v436_v29  ;;  %p536_p0 = pnand %p535_p13, %p529_p10 }
  0x47   :  { %409 = vmatprep.subr.bf16.mxu0 %v408_v26 }
  0x49   :  { %439 = vmatpush3.bf16.msra.mxu1 %v436_v29 }
  0x4a   :  { %411 = vmatpush3.bf16.msra.mxu0 %v408_v26  ;;  %441 = vmatprep.subr.bf16.mxu1 %v440_v35 }
  0x4b   :  { %413 = vmatprep.subr.bf16.mxu0 %v412_v32 }
  0x4d   :  { %443 = vmatpush3.bf16.msra.mxu1 %v440_v35 }
  0x4e   :  { %415 = vmatpush3.bf16.msra.mxu0 %v412_v32  ;;  %445 = vmatprep.subr.bf16.mxu1 %v444_v41 }
  0x4f   :  { %417 = vmatprep.subr.bf16.mxu0 %v416_v38 }
  0x51   :  { %447 = vmatpush3.bf16.msra.mxu1 %v444_v41 }
  0x52   :  { %419 = vmatpush3.bf16.msra.mxu0 %v416_v38  ;;  %449 = vmatprep.subr.bf16.mxu1 %v448_v45 }
  0x53   :  { %421 = vmatprep.subr.bf16.mxu0 %v420_v44 }
  0x55   :  { %451 = vmatpush3.bf16.msra.mxu1 %v448_v45 }
  0x56   :  { %423 = vmatpush3.bf16.msra.mxu0 %v420_v44  ;;  %453 = vmatprep.subr.bf16.mxu1 %v452_v49 }
  0x59   :  { %355 = vmatmul.mubr.f32.vlgmr.msra.gmra.mrb[0].mxu0 %v63_v46  ;;  %455 = vmatpush3.bf16.msra.mxu1 %v452_v49 }
 0x12c   :  { %v356_v51 = vpop.f32.mrb[0].mxu0 }
 0x12d   :  { %v176_v52 = vadd.f32 %v356_v51, %v284_v50  ;;  %v170_v53 = vpop.f32.mrb[1].mxu0 }
 0x12e   :  { %v171_v54 = vadd.f32 %v284_v50, %v170_v53 }
 0x12f   :  { %v180_v56 = vmax.f32 %v176_v52, 0.0 }
 0x130   :  { %v179_v55 = vmax.f32 %v171_v54, 0.0 }
 0x132   :  { %389 = vmatprep.mubr.f32.mxu1 %v179_v55 }
 0x133   :  { %390 = vmatmul.mubr.f32.vlgmr.msra.gmra.mrb[0].mxu1 %v180_v56 }
 0x206   :  { %v391_v58 = vpop.f32.mrb[0].mxu1 }
 0x207   :  { %v259_v59 = vadd.f32 %v391_v58, %v285_v57  ;;  %v253_v60 = vpop.f32.mrb[1].mxu1 }
 0x208   :  { %v254_v61 = vadd.f32 %v285_v57, %v253_v60 }
 0x209   :  { %v263_v62 = vadd.f32 %v259_v59, %v63_v46 }
 0x20a   :  { %v262_v63 = vadd.f32 %v254_v61, %v644_v11 }
 0x20b   :  { %265 = vst [vmem:[#allocation8 + $0x8] sm:$0xff] %v263_v62 }
 0x20c   :  { %264 = vst [vmem:[#allocation8] sm:$0xff] %v262_v63 }
 0x20d   :  { %539 = shalt.err (!%p536_p0)
}
 0x20e   :  { %s540_s12 = scalar_lea.hbm %s674_s5, 256 }
 0x20f   :  { %p541_p1 = scmp.ne.s32.totalorder %s674_s5, %s540_s12  ;;  %p544_p2 = scmp.lt.u32.totalorder %s540_s12, %s674_s5 }
 0x211   :  { %p546_p3 = pnand %p544_p2, %p541_p1 }
 0x213   :  { %549 = shalt.err (!%p546_p3)
}
 0x214   :  { %277 = dma.vmem_to_hbm [thread:$0]  %s272_s10, 256, %s674_s5, [#allocation4], %s558_s30, %s558_s30, %s559_s6  }
 0x215   :  { %554 = dma.done.wait [#allocation4], 256  }
 0x216   :  { %555 = vsyncadd [#allocation4], 4294967040 }
 0x217   :  { %281 = vsyncpa [#allocation3], 1 }
 0x218   :  { %282 = vsyncpa [#allocation6], 1 }
 0x219   :  { %283 = vsyncpa [#allocation4], 1 }

</bundles_post_ra>
